<compile_context>
chip_gen: v7x
topology: tpu7x:2x2x1
jax: 0.10.0
libtpu: 0.0.40
codegen_flags: <defaults>
</compile_context>

<pallas_src>
import numpy as np
import jax
import jax.numpy as jnp
from jax.experimental import pallas as pl
from jax.experimental.pallas import tpu as pltpu


_TARGET_BLOCK_BYTES = 2 << 20  # ~2 MiB per x/out block (85%+ of HBM roofline)


def _build_pe(width: int, max_seq_length: int) -> jnp.ndarray:
    """Sinusoidal table identical to the PyTorch __init__ double loop
    (even dims -> sin(pos / 10000**(i/width)), odd dims -> cos with (i-1))."""
    pos = np.arange(max_seq_length, dtype=np.float64)[:, None]       # (S, 1)
    i = np.arange(width, dtype=np.float64)[None, :]                  # (1, W)
    even = (np.arange(width) % 2 == 0)[None, :]
    exponent = np.where(even, i, i - 1) / width
    angle = pos / np.power(10000.0, exponent)
    pe = np.where(even, np.sin(angle), np.cos(angle)).astype(np.float32)
    return jnp.asarray(pe)[None, :, :]                               # (1, S, W)


def _choose_lane_tile(F: int, itemsize: int, target_bytes: int) -> int:
    """Largest divisor of F that is a multiple of 128 and fits the byte budget;
    falls back to the full extent (always a legal last block dim)."""
    if F % 128 != 0 or F * itemsize <= target_bytes:
        return F
    max_elems = target_bytes // itemsize
    best = None
    d = 1
    while d * d <= F:
        if F % d == 0:
            for cand in (d, F // d):
                if cand % 128 == 0 and cand <= max_elems and (best is None or cand > best):
                    best = cand
        d += 1
    return best if best is not None else F


def _choose_row_tile(B: int, lane_tile: int, itemsize: int, target_bytes: int) -> int:
    """Row tile that divides B and is a multiple of 8 (or the full B extent),
    sized so one block stays near the byte budget."""
    max_rows = max(1, target_bytes // max(1, lane_tile * itemsize))
    if max_rows >= B:
        return B
    for r in range(min(max_rows, B), 0, -1):
        if B % r == 0 and r % 8 == 0:
            return r
    return B  # full extent is always legal


def _add_pe_kernel(x_ref, pe_ref, o_ref):
    # x_ref: (row_tile, lane_tile); pe_ref: (1, lane_tile) broadcast over sublanes.
    o_ref[...] = (x_ref[...] + pe_ref[...]).astype(o_ref.dtype)


def positional_embedding_forward(x: jnp.ndarray, pe: jnp.ndarray) -> jnp.ndarray:
    """x: (B, S, W), pe: (1, S, W) -> x + pe, matching the PyTorch forward."""
    B, S, W = x.shape
    assert pe.shape == (1, S, W)
    F = S * W
    itemsize = jnp.dtype(x.dtype).itemsize

    x2 = x.reshape(B, F)                       # lane-dense 2D layout
    pe2 = pe.astype(x.dtype).reshape(1, F)     # match dtype -> homogeneous add

    lane_tile = _choose_lane_tile(F, itemsize, _TARGET_BLOCK_BYTES)
    row_tile = _choose_row_tile(B, lane_tile, itemsize, _TARGET_BLOCK_BYTES)
    # lane tiles outer, row tiles inner: pe's block index is constant across the
    # inner loop, so its tile stays resident (no re-DMA per row tile).
    grid = (F // lane_tile, B // row_tile)

    out2 = pl.pallas_call(
        _add_pe_kernel,
        out_shape=jax.ShapeDtypeStruct((B, F), x.dtype),
        grid_spec=pl.GridSpec(
            grid=grid,
            in_specs=[
                pl.BlockSpec((row_tile, lane_tile), lambda j, i: (i, j)),   # x
                pl.BlockSpec((1, lane_tile), lambda j, i: (0, j)),          # pe (batch-broadcast)
            ],
            out_specs=pl.BlockSpec((row_tile, lane_tile), lambda j, i: (i, j)),
        ),
        compiler_params=pltpu.CompilerParams(
            dimension_semantics=("parallel", "parallel"),   # independent axes -> megacore shardable
        ),
        input_output_aliases={0: 0},   # semantically x += pe
    )(x2, pe2)
    return out2.reshape(B, S, W)


if __name__ == "__main__":
    # Small shapes implied by the module: batch=2, max_seq_length=8, width=32.
    batch, max_seq_length, width = 2, 8, 32

    key = jax.random.PRNGKey(0)
    x = jax.random.normal(key, (batch, max_seq_length, width), dtype=jnp.float32)
    pe = _build_pe(width, max_seq_length)

    out = jax.block_until_ready(positional_embedding_forward(x, pe))
    ref = x + pe
    np.testing.assert_allclose(np.asarray(out), np.asarray(ref), rtol=1e-6, atol=1e-6)

    # bf16 activations: pe is cast to x.dtype in the wrapper, add stays homogeneous.
    x_bf = x.astype(jnp.bfloat16)
    out_bf = jax.block_until_ready(positional_embedding_forward(x_bf, pe))
    ref_bf = x_bf + pe.astype(jnp.bfloat16)
    np.testing.assert_allclose(
        np.asarray(out_bf.astype(jnp.float32)),
        np.asarray(ref_bf.astype(jnp.float32)),
        rtol=1e-2, atol=1e-2,
    )

    print("KERNEL_OK")
</pallas_src>

<mosaic_0001>
module attributes {stable_mosaic.version = 11 : i64} {
  func.func @_add_pe_kernel(%arg0: i32, %arg1: i32, %arg2: memref<2x256xf32, #tpu.memory_space<vmem>>, %arg3: memref<1x256xf32, #tpu.memory_space<vmem>>, %arg4: memref<2x256xf32, #tpu.memory_space<vmem>>) attributes {dimension_semantics = [#tpu.dimension_semantics<parallel>, #tpu.dimension_semantics<parallel>], iteration_bounds = array<i64: 1, 1>, scalar_prefetch = 0 : i64, scratch_operands = 0 : i64, tpu.core_type = #tpu.core_type<tc>, window_params = [{transform_indices = @transform_0, window_bounds = array<i64: 2, 256>}, {transform_indices = @transform_1, window_bounds = array<i64: 1, 256>}, {transform_indices = @transform_2, window_bounds = array<i64: 2, 256>}]} {
    %c0 = arith.constant 0 : index
    %c0_0 = arith.constant 0 : index
    %0 = vector.load %arg2[%c0, %c0_0] : memref<2x256xf32, #tpu.memory_space<vmem>>, vector<2x256xf32>
    %c0_1 = arith.constant 0 : index
    %c0_2 = arith.constant 0 : index
    %1 = vector.load %arg3[%c0_1, %c0_2] : memref<1x256xf32, #tpu.memory_space<vmem>>, vector<1x256xf32>
    %2 = vector.broadcast %1 : vector<1x256xf32> to vector<2x256xf32>
    %3 = arith.addf %0, %2 : vector<2x256xf32>
    %c0_3 = arith.constant 0 : index
    %c0_4 = arith.constant 0 : index
    %4 = vector.load %arg4[%c0_3, %c0_4] : memref<2x256xf32, #tpu.memory_space<vmem>>, vector<2x256xf32>
    tpu.vector_store %arg4[%c0_3, %c0_4], %3 {strides = array<i32>} : memref<2x256xf32, #tpu.memory_space<vmem>>, vector<2x256xf32>,
    return
  }
  func.func @transform_0(%arg0: i32, %arg1: i32) -> (i32, i32) {
    %c0_i32 = arith.constant 0 : i32
    return %arg1, %arg0 : i32, i32
  }
  func.func @transform_1(%arg0: i32, %arg1: i32) -> (i32, i32) {
    %c0_i32 = arith.constant 0 : i32
    %c0_i32_0 = arith.constant 0 : i32
    return %c0_i32, %arg0 : i32, i32
  }
  func.func @transform_2(%arg0: i32, %arg1: i32) -> (i32, i32) {
    %c0_i32 = arith.constant 0 : i32
    return %arg1, %arg0 : i32, i32
  }
}

</mosaic_0001>

<bundles_post_ra>
// kernel: tpu_custom_call.1
= control target key start
LH: loop header
LB: loop body
LE: loop exit
PB: predicated region body
PF: predicated region fallthrough
CT: control target
= control target key end

     0   :  { %7 = vsyncpa [#allocation3], 0  ;;  %s157_s0 = inlined_call_operand.hbm [shape: f32[2,256], index: 0, kind: input, shape index: {}, may-alias: {0,2}]   ;;  %s158_s1 = inlined_call_operand.vmem [shape: f32[1,256], index: 1, kind: input, shape index: {}]   ;;  %s159_s2 = inlined_call_operand.hbm [shape: f32[2,256], index: 2, kind: output, shape index: {}, may-alias: {0,2}]  }
   0x1   :  { %8 = vsyncpa [#allocation4], 0  ;;  %s112_s9 = smov [#allocation2]   ;;  %s64_s13 = scalar_lea.hbm %s157_s0, 64 }
   0x2   :  { %s15_s10 = sshll.u32 %s112_s9, 4  ;;  %p65_p0 = scmp.ne.s32.totalorder %s157_s0, %s64_s13  ;;  %s16_s10 = int_to_ptr.vmem [resolvable:$true] %s15_s10 }
   0x3   :  { %p68_p1 = scmp.lt.u32.totalorder %s64_s13, %s157_s0 }
   0x5   :  { %p70_p2 = pnand %p68_p1, %p65_p0 }
   0x7   :  { %73 = shalt.err (!%p70_p2)
}
   0x8   :  { %s74_s18 = scalar_lea.vmem %s16_s10, 64  ;;  %p79_p4 = scmp.lt.s32.totalorder %s16_s10, %s16_s10 }
   0x9   :  { %p75_p3 = scmp.ne.s32.totalorder %s16_s10, %s74_s18  ;;  %p80_p5 = scmp.lt.s32.totalorder %s74_s18, %s74_s18 }
   0xb   :  { %p81_p6 = por %p80_p5, %p79_p4 }
   0xd   :  { %p82_p7 = pnand %p81_p6, %p75_p3 }
   0xf   :  { %85 = shalt.err (!%p82_p7)
}
  0x10   :  { %18 = dma.hbm_to_vmem [thread:$0]  %s157_s0, 64, %s16_s10, [#allocation3]  }
  0x11   :  { %108 = dma.done.wait [#allocation3], 64  }
  0x12   :  { %109 = vsyncadd [#allocation3], 4294967232  ;;  %v27_v0 = vlaneseq  ;;  %v113_v1 = vmov 1983009808   ;;  %v25_v7 = vld [vmem:[%s158_s1] sm:$0x3] }
  0x13   :  { %v37_v2 = vunpack.c.l.s4 %v113_v1  ;;  %v24_v12 = vld [vmem:[#allocation2] sm:$0xf]  ;;  %s114_s23 = smov [#allocation5]  }
  0x14   :  { %v28_v3 = vshrl.u32 %v27_v0, 7  ;;  %s52_s0 = sshll.u32 %s114_s23, 4  ;;  %s53_s0 = int_to_ptr.vmem [resolvable:$true] %s52_s0 }
  0x15   :  { %v38_v6 = vunpack.c.0.s8 %v37_v2  ;;  %s86_s24 = scalar_lea.vmem %s53_s0, 64  ;;  %p91_p9 = scmp.lt.s32.totalorder %s53_s0, %s53_s0 }
  0x16   :  { %v29_v4 = vsub.s32 0, %v28_v3  ;;  %v33_v5 = vsub.s32 1, %v28_v3  ;;  %p87_p8 = scmp.ne.s32.totalorder %s53_s0, %s86_s24  ;;  %p92_p10 = scmp.lt.s32.totalorder %s86_s24, %s86_s24 }
  0x17   :  { %v41_v10 = vsub.s32 %v38_v6, %v28_v3 }
  0x18   :  { %v30_v8 = vrot.slane %v25_v7, %v29_v4  ;;  %v34_v9 = vrot.slane %v25_v7, %v33_v5  ;;  %p93_p11 = por %p92_p10, %p91_p9 }
  0x1a   :  { %v35_v11 = vcombine.low %v30_v8, %v34_v9  ;;  %p94_p12 = pnand %p93_p11, %p87_p8 }
  0x1c   :  { %v42_v13 = vrot.slane %v35_v11, %v41_v10 }
  0x1e   :  { %v44_v14 = vadd.f32 %v42_v13, %v24_v12 }
  0x20   :  { %45 = vst [vmem:[#allocation5] sm:$0xf] %v44_v14 }
  0x21   :  { %97 = shalt.err (!%p94_p12)
}
  0x22   :  { %s98_s26 = scalar_lea.hbm %s159_s2, 64 }
  0x23   :  { %p99_p13 = scmp.ne.s32.totalorder %s159_s2, %s98_s26  ;;  %p102_p0 = scmp.lt.u32.totalorder %s98_s26, %s159_s2 }
  0x25   :  { %p104_p1 = pnand %p102_p0, %p99_p13 }
  0x27   :  { %107 = shalt.err (!%p104_p1)
}
  0x28   :  { %55 = dma.vmem_to_hbm [thread:$0]  %s53_s0, 64, %s159_s2, [#allocation4]  }
  0x29   :  { %110 = dma.done.wait [#allocation4], 64  }
  0x2a   :  { %111 = vsyncadd [#allocation4], 4294967232 }
  0x2b   :  { %59 = vsyncpa [#allocation3], 1 }
  0x2c   :  { %60 = vsyncpa [#allocation4], 1 }

</bundles_post_ra>
